<compile_context>
chip_gen: v7x
topology: tpu7x:2x2x1
jax: 0.10.0
libtpu: 0.0.40
codegen_flags: <defaults>
</compile_context>

<pallas_src>
import math

import jax
import jax.numpy as jnp
from jax.experimental import pallas as pl
from jax.experimental.pallas import tpu as pltpu


def _bahdanau_kernel(wa_dh_ref, enc_ref, ua_t_ref, va_ref, ctx_ref, w_ref):
    # wa_dh_ref: (TB, 1, H)  precomputed Wa(decoder_hidden) for this batch block
    # enc_ref:   (TB, S, H)  encoder outputs for this batch block
    # ua_t_ref:  (H, H)      Ua.weight transposed (x @ ua_t == Ua(x))
    # va_ref:    (1, H)      va.weight (row vector)
    # ctx_ref:   (TB, 1, H)  output context
    # w_ref:     (TB, 1, S)  output attention weights (lane-dense along S)
    TB, S, H = enc_ref.shape

    enc = enc_ref[...]                                   # (TB, S, H) native dtype

    # Ua projection: single flattened MXU matmul, f32 accumulation.
    ua_enc = jnp.dot(
        enc.reshape(TB * S, H), ua_t_ref[...],
        preferred_element_type=jnp.float32,
    ).reshape(TB, S, H)                                  # (TB, S, H) f32

    wa_dh = wa_dh_ref[...].astype(jnp.float32)           # (TB, 1, H)
    t = jnp.tanh(ua_enc + wa_dh)                         # (TB, S, H) broadcast over S

    # score = <t, va> over H : VPU multiply + lane reduction (no N=1 matmul).
    va = va_ref[...].astype(jnp.float32)                 # (1, H)
    score = jnp.sum(t * va[None, :, :], axis=-1)         # (TB, S)

    # softmax over the sequence axis (lane axis of the (TB, S) tile).
    m = jnp.max(score, axis=-1, keepdims=True)
    e = jnp.exp(score - m)
    w = e * pl.reciprocal(jnp.sum(e, axis=-1, keepdims=True), approx=False)  # (TB, S)

    # Lane-dense store of the weights (last dim = S).
    w_ref[...] = w[:, None, :].astype(w_ref.dtype)       # (TB, 1, S)

    # context = sum_s w[s] * enc[s] : VPU multiply + sublane reduce, f32 accum.
    ctx = jnp.sum(w[:, :, None] * enc, axis=1)           # (TB, H) f32
    ctx_ref[...] = ctx[:, None, :].astype(ctx_ref.dtype)


def _pick_block_b(B, S, H, itemsize, *, target_rows=256, enc_budget_bytes=24 << 20):
    """Largest TB dividing B whose double-buffered encoder block fits the VMEM
    budget; stop growing once the flattened MXU M-tile (TB*S) reaches target."""
    best = 1
    for tb in range(1, B + 1):
        if B % tb:
            continue
        if 2 * tb * S * H * itemsize > enc_budget_bytes:
            break
        best = tb
        if tb * S >= target_rows:
            break
    return best


def bahdanau_attention(decoder_hidden, encoder_outputs, wa_w, ua_w, va_w,
                       *, block_b=None):
    """
    decoder_hidden:  (B, 1, H)
    encoder_outputs: (B, S, H)
    wa_w, ua_w:      (H, H)  PyTorch-style Linear weight (out, in)
    va_w:            (1, H)
    Returns (context (B, 1, H), weights (B, S, 1)).
    """
    B, S, H = encoder_outputs.shape
    dtype = encoder_outputs.dtype

    # Hoist Wa(decoder_hidden): one well-shaped (B,H)@(H,H) matmul in the wrapper.
    wa_dh = jnp.dot(
        decoder_hidden.reshape(B, H), wa_w.T,
        preferred_element_type=jnp.float32,
    ).reshape(B, 1, H)

    ua_t = ua_w.T            # (H, H)
    va = va_w                # (1, H)

    TB = block_b if block_b is not None else _pick_block_b(
        B, S, H, jnp.dtype(dtype).itemsize)
    grid = (B // TB,)

    out_shapes = (
        jax.ShapeDtypeStruct((B, 1, H), dtype),   # context
        jax.ShapeDtypeStruct((B, 1, S), dtype),   # weights, lane-dense along S
    )

    ctx, w_raw = pl.pallas_call(
        _bahdanau_kernel,
        out_shape=out_shapes,
        grid_spec=pltpu.PrefetchScalarGridSpec(
            num_scalar_prefetch=0,
            grid=grid,
            in_specs=[
                pl.BlockSpec((TB, 1, H), lambda b: (b, 0, 0)),   # Wa(dh)
                pl.BlockSpec((TB, S, H), lambda b: (b, 0, 0)),   # encoder outputs
                pl.BlockSpec((H, H), lambda b: (0, 0)),          # Ua^T
                pl.BlockSpec((1, H), lambda b: (0, 0)),          # va
            ],
            out_specs=[
                pl.BlockSpec((TB, 1, H), lambda b: (b, 0, 0)),   # context
                pl.BlockSpec((TB, 1, S), lambda b: (b, 0, 0)),   # weights
            ],
        ),
        compiler_params=pltpu.CompilerParams(
            dimension_semantics=("parallel",),
            vmem_limit_bytes=64 * 1024 * 1024,
        ),
    )(wa_dh, encoder_outputs, ua_t, va)

    # Present the module's (B, S, 1) weight layout (layout plumbing only).
    weights = w_raw.reshape(B, S, 1)
    return ctx, weights


def _xavier_uniform(key, out_dim, in_dim, dtype=jnp.float32):
    # Matches nn.init.xavier_uniform_ for an nn.Linear weight of shape (out, in).
    bound = math.sqrt(6.0 / (in_dim + out_dim))
    return jax.random.uniform(key, (out_dim, in_dim), dtype=dtype,
                              minval=-bound, maxval=bound)


def _reference(decoder_hidden, encoder_outputs, wa_w, ua_w, va_w):
    # Pure-JAX reference mirroring the PyTorch forward.
    wa_dh = jnp.einsum('bqh,oh->bqo', decoder_hidden, wa_w)
    ua_enc = jnp.einsum('bsh,oh->bso', encoder_outputs, ua_w)
    score = jnp.einsum('bsh,oh->bso', jnp.tanh(wa_dh + ua_enc), va_w)  # (B,S,1)
    weights = jax.nn.softmax(score, axis=1)
    context = jnp.einsum('bso,bsh->boh', weights, encoder_outputs)     # (B,1,H)
    return context, weights


if __name__ == "__main__":
    B, S, H = 2, 8, 32
    key = jax.random.PRNGKey(0)
    k_dh, k_enc, k_wa, k_ua, k_va = jax.random.split(key, 5)

    decoder_hidden = jax.random.normal(k_dh, (B, 1, H), dtype=jnp.float32)
    encoder_outputs = jax.random.normal(k_enc, (B, S, H), dtype=jnp.float32)

    # Deterministic parameter init (xavier_uniform, bias=False).
    wa_w = _xavier_uniform(k_wa, H, H)   # Wa.weight: (H, H)
    ua_w = _xavier_uniform(k_ua, H, H)   # Ua.weight: (H, H)
    va_w = _xavier_uniform(k_va, 1, H)   # va.weight: (1, H)

    ctx, w = bahdanau_attention(decoder_hidden, encoder_outputs, wa_w, ua_w, va_w)
    jax.block_until_ready((ctx, w))

    ctx_ref, w_ref = _reference(decoder_hidden, encoder_outputs, wa_w, ua_w, va_w)
    assert ctx.shape == (B, 1, H) and w.shape == (B, S, 1)
    assert jnp.allclose(ctx, ctx_ref, atol=1e-5, rtol=1e-5)
    assert jnp.allclose(w, w_ref, atol=1e-5, rtol=1e-5)

    print("KERNEL_OK")
</pallas_src>

<mosaic_0001>
module attributes {stable_mosaic.version = 11 : i64} {
  func.func @_bahdanau_kernel(%arg0: i32, %arg1: memref<2x1x32xf32, #tpu.memory_space<vmem>>, %arg2: memref<2x8x32xf32, #tpu.memory_space<vmem>>, %arg3: memref<32x32xf32, #tpu.memory_space<vmem>>, %arg4: memref<1x32xf32, #tpu.memory_space<vmem>>, %arg5: memref<2x1x32xf32, #tpu.memory_space<vmem>>, %arg6: memref<2x1x8xf32, #tpu.memory_space<vmem>>) attributes {dimension_semantics = [#tpu.dimension_semantics<parallel>], iteration_bounds = array<i64: 1>, scalar_prefetch = 0 : i64, scratch_operands = 0 : i64, tpu.core_type = #tpu.core_type<tc>, window_params = [{transform_indices = @transform_0, window_bounds = array<i64: 2, 1, 32>}, {transform_indices = @transform_1, window_bounds = array<i64: 2, 8, 32>}, {pipeline_mode = #tpu.pipeline_mode<synchronous>, transform_indices = @transform_2, window_bounds = array<i64: 32, 32>}, {pipeline_mode = #tpu.pipeline_mode<synchronous>, transform_indices = @transform_3, window_bounds = array<i64: 1, 32>}, {transform_indices = @transform_4, window_bounds = array<i64: 2, 1, 32>}, {transform_indices = @transform_5, window_bounds = array<i64: 2, 1, 8>}]} {
    %c0 = arith.constant 0 : index
    %c0_0 = arith.constant 0 : index
    %c0_1 = arith.constant 0 : index
    %0 = vector.load %arg2[%c0, %c0_0, %c0_1] : memref<2x8x32xf32, #tpu.memory_space<vmem>>, vector<2x8x32xf32>
    %1 = vector.shape_cast %0 : vector<2x8x32xf32> to vector<16x32xf32>
    %c0_2 = arith.constant 0 : index
    %c0_3 = arith.constant 0 : index
    %2 = vector.load %arg3[%c0_2, %c0_3] : memref<32x32xf32, #tpu.memory_space<vmem>>, vector<32x32xf32>
    %cst = arith.constant dense<0.000000e+00> : vector<16x32xf32>
    %3 = tpu.matmul %1, %2, %cst {dimension_numbers = #tpu.dot_dimension_numbers<[1], [0], [0], [1], [0, 0, 1, 1], [], []>} : vector<16x32xf32>, vector<32x32xf32>, vector<16x32xf32> -> vector<16x32xf32>
    %4 = vector.shape_cast %3 : vector<16x32xf32> to vector<2x8x32xf32>
    %c0_4 = arith.constant 0 : index
    %c0_5 = arith.constant 0 : index
    %c0_6 = arith.constant 0 : index
    %5 = vector.load %arg1[%c0_4, %c0_5, %c0_6] : memref<2x1x32xf32, #tpu.memory_space<vmem>>, vector<2x1x32xf32>
    %6 = vector.broadcast %5 : vector<2x1x32xf32> to vector<2x8x32xf32>
    %7 = arith.addf %4, %6 : vector<2x8x32xf32>
    %8 = math.tanh %7 : vector<2x8x32xf32>
    %c0_7 = arith.constant 0 : index
    %c0_8 = arith.constant 0 : index
    %9 = vector.load %arg4[%c0_7, %c0_8] : memref<1x32xf32, #tpu.memory_space<vmem>>, vector<1x32xf32>
    %10 = vector.shape_cast %9 : vector<1x32xf32> to vector<1x1x32xf32>
    %11 = vector.broadcast %10 : vector<1x1x32xf32> to vector<2x8x32xf32>
    %12 = arith.mulf %8, %11 : vector<2x8x32xf32>
    %cst_9 = arith.constant dense<0.000000e+00> : vector<2x8xf32>
    %13 = vector.multi_reduction <add>, %12, %cst_9 [2] : vector<2x8x32xf32> to vector<2x8xf32>
    %cst_10 = arith.constant dense<0xFF800000> : vector<2xf32>
    %14 = vector.multi_reduction <maximumf>, %13, %cst_10 [1] : vector<2x8xf32> to vector<2xf32>
    %15 = vector.shape_cast %14 : vector<2xf32> to vector<2x1xf32>
    %16 = vector.broadcast %15 : vector<2x1xf32> to vector<2x8xf32>
    %17 = arith.subf %13, %16 : vector<2x8xf32>
    %18 = math.exp %17 : vector<2x8xf32>
    %cst_11 = arith.constant dense<0.000000e+00> : vector<2xf32>
    %19 = vector.multi_reduction <add>, %18, %cst_11 [1] : vector<2x8xf32> to vector<2xf32>
    %20 = vector.shape_cast %19 : vector<2xf32> to vector<2x1xf32>
    %21 = tpu.reciprocal %20 : vector<2x1xf32> -> vector<2x1xf32>
    %22 = vector.broadcast %21 : vector<2x1xf32> to vector<2x8xf32>
    %23 = arith.mulf %18, %22 : vector<2x8xf32>
    %24 = vector.shape_cast %23 : vector<2x8xf32> to vector<2x1x8xf32>
    %c0_12 = arith.constant 0 : index
    %c0_13 = arith.constant 0 : index
    %c0_14 = arith.constant 0 : index
    %25 = vector.load %arg6[%c0_12, %c0_13, %c0_14] : memref<2x1x8xf32, #tpu.memory_space<vmem>>, vector<2x1x8xf32>
    tpu.vector_store %arg6[%c0_12, %c0_13, %c0_14], %24 {strides = array<i32>} : memref<2x1x8xf32, #tpu.memory_space<vmem>>, vector<2x1x8xf32>,
    %26 = vector.shape_cast %23 : vector<2x8xf32> to vector<2x8x1xf32>
    %27 = vector.broadcast %26 : vector<2x8x1xf32> to vector<2x8x32xf32>
    %28 = arith.mulf %27, %0 : vector<2x8x32xf32>
    %cst_15 = arith.constant dense<0.000000e+00> : vector<2x32xf32>
    %29 = vector.multi_reduction <add>, %28, %cst_15 [1] : vector<2x8x32xf32> to vector<2x32xf32>
    %30 = vector.shape_cast %29 : vector<2x32xf32> to vector<2x1x32xf32>
    %c0_16 = arith.constant 0 : index
    %c0_17 = arith.constant 0 : index
    %c0_18 = arith.constant 0 : index
    %31 = vector.load %arg5[%c0_16, %c0_17, %c0_18] : memref<2x1x32xf32, #tpu.memory_space<vmem>>, vector<2x1x32xf32>
    tpu.vector_store %arg5[%c0_16, %c0_17, %c0_18], %30 {strides = array<i32>} : memref<2x1x32xf32, #tpu.memory_space<vmem>>, vector<2x1x32xf32>,
    return
  }
  func.func @transform_0(%arg0: i32) -> (i32, i32, i32) {
    %c0_i32 = arith.constant 0 : i32
    %c0_i32_0 = arith.constant 0 : i32
    %c0_i32_1 = arith.constant 0 : i32
    return %arg0, %c0_i32, %c0_i32_0 : i32, i32, i32
  }
  func.func @transform_1(%arg0: i32) -> (i32, i32, i32) {
    %c0_i32 = arith.constant 0 : i32
    %c0_i32_0 = arith.constant 0 : i32
    %c0_i32_1 = arith.constant 0 : i32
    return %arg0, %c0_i32, %c0_i32_0 : i32, i32, i32
  }
  func.func @transform_2(%arg0: i32) -> (i32, i32) {
    %c0_i32 = arith.constant 0 : i32
    %c0_i32_0 = arith.constant 0 : i32
    %c0_i32_1 = arith.constant 0 : i32
    return %c0_i32, %c0_i32_0 : i32, i32
  }
  func.func @transform_3(%arg0: i32) -> (i32, i32) {
    %c0_i32 = arith.constant 0 : i32
    %c0_i32_0 = arith.constant 0 : i32
    %c0_i32_1 = arith.constant 0 : i32
    return %c0_i32, %c0_i32_0 : i32, i32
  }
  func.func @transform_4(%arg0: i32) -> (i32, i32, i32) {
    %c0_i32 = arith.constant 0 : i32
    %c0_i32_0 = arith.constant 0 : i32
    %c0_i32_1 = arith.constant 0 : i32
    return %arg0, %c0_i32, %c0_i32_0 : i32, i32, i32
  }
  func.func @transform_5(%arg0: i32) -> (i32, i32, i32) {
    %c0_i32 = arith.constant 0 : i32
    %c0_i32_0 = arith.constant 0 : i32
    %c0_i32_1 = arith.constant 0 : i32
    return %arg0, %c0_i32, %c0_i32_0 : i32, i32, i32
  }
}

</mosaic_0001>

<bundles_post_ra>
// kernel: tpu_custom_call.1
= control target key start
LH: loop header
LB: loop body
LE: loop exit
PB: predicated region body
PF: predicated region fallthrough
CT: control target
= control target key end

     0   :  { %11 = vsyncpa [#allocation3], 0  ;;  %s684_s0 = inlined_call_operand.hbm [shape: f32[2,1,32], index: 0, kind: input, shape index: {}]   ;;  %s685_s1 = inlined_call_operand.hbm [shape: f32[2,8,32], index: 1, kind: input, shape index: {}]   ;;  %s686_s2 = inlined_call_operand.hbm [shape: f32[32,32], index: 2, kind: input, shape index: {}]   ;;  %s687_s3 = inlined_call_operand.hbm [shape: f32[1,32], index: 3, kind: input, shape index: {}]   ;;  %s688_s4 = inlined_call_operand.hbm [shape: f32[2,1,32], index: 4, kind: output, shape index: {0}]   ;;  %s689_s5 = inlined_call_operand.hbm [shape: f32[2,1,8], index: 5, kind: output, shape index: {1}]  }
   0x1   :  { %12 = vsyncpa [#allocation6], 0 }
   0x2   :  { %13 = vsyncpa [#allocation9], 0 }
   0x3   :  { %14 = vsyncpa [#allocation4], 0 }
   0x4   :  { %15 = vsyncpa [#allocation12], 0  ;;  %s538_s18 = smov [#allocation5]   ;;  %s396_s22 = scalar_lea.hbm %s685_s1, 256 }
   0x5   :  { %s33_s19 = sshll.u32 %s538_s18, 4  ;;  %p397_p0 = scmp.ne.s32.totalorder %s685_s1, %s396_s22  ;;  %s34_s19 = int_to_ptr.vmem [resolvable:$true] %s33_s19 }
   0x6   :  { %p400_p1 = scmp.lt.u32.totalorder %s396_s22, %s685_s1 }
   0x8   :  { %p402_p2 = pnand %p400_p1, %p397_p0 }
   0xa   :  { %405 = shalt.err (!%p402_p2)
}
   0xb   :  { %s406_s27 = scalar_lea.vmem %s34_s19, 256  ;;  %p411_p4 = scmp.lt.s32.totalorder %s34_s19, %s34_s19 }
   0xc   :  { %p407_p3 = scmp.ne.s32.totalorder %s34_s19, %s406_s27  ;;  %p412_p5 = scmp.lt.s32.totalorder %s406_s27, %s406_s27 }
   0xe   :  { %p413_p6 = por %p412_p5, %p411_p4 }
  0x10   :  { %p414_p7 = pnand %p413_p6, %p407_p3 }
  0x12   :  { %417 = shalt.err (!%p414_p7)
}
  0x13   :  { %s539_s28 = smov 128   ;;  %s540_s29 = smov 8  }
  0x14   :  { %39 = dma.hbm_to_vmem [thread:$0]  %s685_s1, 256, %s34_s19, [#allocation6], %s539_s28, %s539_s28, %s540_s29  }
  0x15   :  { %s541_s7 = smov [#allocation2]   ;;  %s418_s11 = scalar_lea.hbm %s684_s0, 32 }
  0x16   :  { %s21_s8 = sshll.u32 %s541_s7, 4  ;;  %p419_p8 = scmp.ne.s32.totalorder %s684_s0, %s418_s11  ;;  %s22_s8 = int_to_ptr.vmem [resolvable:$true] %s21_s8 }
  0x17   :  { %p422_p9 = scmp.lt.u32.totalorder %s418_s11, %s684_s0 }
  0x19   :  { %p424_p10 = pnand %p422_p9, %p419_p8 }
  0x1b   :  { %427 = shalt.err (!%p424_p10)
}
  0x1c   :  { %s428_s16 = scalar_lea.vmem %s22_s8, 32  ;;  %p433_p12 = scmp.lt.s32.totalorder %s22_s8, %s22_s8 }
  0x1d   :  { %p429_p11 = scmp.ne.s32.totalorder %s22_s8, %s428_s16  ;;  %p434_p13 = scmp.lt.s32.totalorder %s428_s16, %s428_s16 }
  0x1f   :  { %p435_p0 = por %p434_p13, %p433_p12 }
  0x21   :  { %p436_p1 = pnand %p435_p0, %p429_p11 }
  0x23   :  { %439 = shalt.err (!%p436_p1)
}
  0x24   :  { %s542_s1 = smov 16   ;;  %s543_s17 = smov 1  }
  0x25   :  { %27 = dma.hbm_to_vmem [thread:$0]  %s684_s0, 32, %s22_s8, [#allocation3], %s542_s1, %s542_s1, %s543_s17  }
  0x26   :  { %s544_s20 = smov [#allocation7]   ;;  %s545_s22 = smov [#allocation8]  }
  0x27   :  { %s45_s21 = sshll.u32 %s544_s20, 4  ;;  %s58_s23 = sshll.u32 %s545_s22, 4  ;;  %s46_s21 = int_to_ptr.vmem [resolvable:$true] %s45_s21  ;;  %s59_s23 = int_to_ptr.vmem [resolvable:$true] %s58_s23 }
  0x28   :  { %s440_s26 = scalar_lea.hbm %s686_s2, 512 }
  0x29   :  { %p441_p2 = scmp.ne.s32.totalorder %s686_s2, %s440_s26  ;;  %p444_p3 = scmp.lt.u32.totalorder %s440_s26, %s686_s2 }
  0x2b   :  { %p446_p4 = pnand %p444_p3, %p441_p2 }
  0x2d   :  { %449 = shalt.err (!%p446_p4)
}
  0x2e   :  { %s450_s0 = scalar_lea.vmem %s46_s21, 512  ;;  %p455_p6 = scmp.lt.s32.totalorder %s46_s21, %s46_s21 }
  0x2f   :  { %p451_p5 = scmp.ne.s32.totalorder %s46_s21, %s450_s0  ;;  %p456_p7 = scmp.lt.s32.totalorder %s450_s0, %s450_s0 }
  0x31   :  { %p457_p8 = por %p456_p7, %p455_p6 }
  0x33   :  { %p458_p9 = pnand %p457_p8, %p451_p5 }
  0x35   :  { %461 = shalt.err (!%p458_p9)
}
  0x36   :  { %51 = dma.hbm_to_vmem [thread:$0]  %s686_s2, 512, %s46_s21, [#allocation6], %s539_s28, %s539_s28, %s540_s29  }
  0x37   :  { %s462_s12 = scalar_lea.hbm %s687_s3, 16 }
  0x38   :  { %p463_p10 = scmp.ne.s32.totalorder %s687_s3, %s462_s12  ;;  %p466_p11 = scmp.lt.u32.totalorder %s462_s12, %s687_s3 }
  0x3a   :  { %p468_p12 = pnand %p466_p11, %p463_p10 }
  0x3c   :  { %471 = shalt.err (!%p468_p12)
}
  0x3d   :  { %s472_s18 = scalar_lea.vmem %s59_s23, 16  ;;  %s476_s19 = scalar_lea.vmem %s59_s23, 32 }
  0x3e   :  { %p473_p13 = scmp.ne.s32.totalorder %s59_s23, %s472_s18  ;;  %p477_p0 = scmp.lt.s32.totalorder %s59_s23, %s59_s23 }
  0x3f   :  { %p478_p1 = scmp.lt.s32.totalorder %s476_s19, %s472_s18 }
  0x41   :  { %p479_p2 = por %p478_p1, %p477_p0 }
  0x43   :  { %p480_p3 = pnand %p479_p2, %p473_p13 }
  0x45   :  { %483 = shalt.err (!%p480_p3)
}
  0x46   :  { %61 = dma.hbm_to_vmem [thread:$0]  %s687_s3, 16, %s59_s23, [#allocation9]  }
  0x47   :  { %528 = dma.done.wait [#allocation3], 32  }
  0x48   :  { %529 = vsyncadd [#allocation3], 4294967264 }
  0x49   :  { %530 = dma.done.wait [#allocation6], 768  }
  0x4a   :  { %531 = vsyncadd [#allocation6], 4294966528 }
  0x4b   :  { %532 = dma.done.wait [#allocation9], 16  }
  0x4c   :  { %533 = vsyncadd [#allocation9], 4294967280  ;;  %vm80_vm0 = vcmask 261120   ;;  %v76_v0 = vld [vmem:[#allocation7] sm:$0xff]  ;;  %v77_v1 = vld [vmem:[#allocation7 + $0x8] sm:$0xff]  ;;  %v197_v21 = vlaneseq  ;;  %vm207_vm1 = vcmask 1041409  }
  0x4d   :  { %v78_v2 = vld [vmem:[#allocation7 + $0x10] sm:$0xff]  ;;  %v365_v3 = vpack.c.bf16 %v77_v1, %v76_v0  ;;  %v79_v4 = vld [vmem:[#allocation7 + $0x18] sm:$0xff]  ;;  %v346_v8 = vld [vmem:[#allocation2 + $0x1] ss:$0 sm:$0xff]  ;;  %vm210_vm2 = vcmask 58368   ;;  %v546_v31 = vmov 0  }
  0x4e   :  { %v636_v5 = vld [vmem:[#allocation5] sm:$0xff]  ;;  %v369_v6 = vpack.c.bf16 %v79_v4, %v78_v2  ;;  %v640_v7 = vld [vmem:[#allocation5 + $0x8] sm:$0xff]  ;;  %v345_v9 = vld [vmem:[#allocation2] ss:$0 sm:$0xff]  ;;  %v198_v22 = vand.u32 127, %v197_v21  ;;  %v200_v23 = vshrl.u32 %v197_v21, 7  ;;  %385 = vset.pattern.permute.xlu0 %v546_v31  ;;  %384 = vset.pattern.permute.xlu1 %v546_v31 }
  0x4f   :  { %362 = vmatprep.mubr.msk.f32.mxu0 %vm80_vm0, %v636_v5  ;;  %366 = vmatprep.subr.bf16.mxu0 %v365_v3  ;;  %v347_v14 = vld [vmem:[#allocation8] ss:$0 sm:$0xff]  ;;  %vm284_vm3 = vcmask 57344   ;;  %s547_s3 = smov [#allocation11]  }
  0x50   :  { %368 = vmatpush3.bf16.msra.mxu0 %v365_v3  ;;  %v201_v25 = vsub.s32 %v198_v22, %v200_v23  ;;  %v217_v32 = vsub.s32 0, %v200_v23  ;;  %v221_v33 = vsub.s32 1, %v200_v23  ;;  %s325_s29 = sshll.u32 %s547_s3, 4  ;;  %s326_s29 = int_to_ptr.vmem [resolvable:$true] %s325_s29 }
  0x51   :  { %370 = vmatprep.subr.bf16.mxu0 %v369_v6  ;;  %s484_s20 = scalar_lea.vmem %s326_s29, 32  ;;  %p489_p5 = scmp.lt.s32.totalorder %s326_s29, %s326_s29 }
  0x52   :  { %p485_p4 = scmp.ne.s32.totalorder %s326_s29, %s484_s20  ;;  %p490_p6 = scmp.lt.s32.totalorder %s484_s20, %s484_s20 }
  0x54   :  { %372 = vmatpush3.bf16.msra.mxu0 %v369_v6  ;;  %p491_p7 = por %p490_p6, %p489_p5 }
  0x56   :  { %p492_p8 = pnand %p491_p7, %p485_p4 }
  0x57   :  { %363 = vmatmul.mubr.msk.f32.vlgmr.msra.gmra.mrb[0].mxu0 %vm80_vm0, %v640_v7 }
 0x12a   :  { %v364_v10 = vpop.f32.mrb[0].mxu0 }
 0x12b   :  { %v177_v11 = vadd.f32 %v364_v10, %v346_v8  ;;  %v153_v12 = vpop.f32.mrb[1].mxu0 }
 0x12c   :  { %v176_v13 = vadd.f32 %v345_v9, %v153_v12 }
 0x12d   :  { %386 = vtanh.f32 %v177_v11 }
 0x12e   :  { %388 = vtanh.f32 %v176_v13 }
 0x137   :  { %v387_v15 = vpop.eup %386 }
 0x138   :  { %v389_v16 = vpop.eup %388  ;;  %v188_v19 = vmul.f32 %v387_v15, %v347_v14 }
 0x139   :  { %v187_v17 = vmul.f32 %v389_v16, %v347_v14 }
 0x13a   :  { %v192_v20 = vsel %vm80_vm0, %v188_v19, 0.0 }
 0x13b   :  { %v189_v18 = vsel %vm80_vm0, %v187_v17, 0.0 }
 0x13c   :  { %190 = vadd.xlane.f32.xlu0 %v189_v18 }
 0x140   :  { %193 = vadd.xlane.f32.xlu0 %v192_v20 }
 0x1c9   :  { %v191_v24 = vpop.xlane.xlu0 %190 }
 0x1ca   :  { %v202_v27 = vrot.slane %v191_v24, %v201_v25 }
 0x1cd   :  { %v194_v26 = vpop.xlane.xlu0 %193 }
 0x1ce   :  { %v206_v28 = vrot.slane %v194_v26, %v201_v25 }
 0x1d0   :  { %v208_v29 = vsel %vm207_vm1, %v206_v28, %v202_v27 }
 0x1d1   :  { %v211_v30 = vsel %vm210_vm2, %v208_v29, -inf }
 0x1d2   :  { %212 = vmax.xlane.f32.xlu1 %v211_v30 }
 0x25f   :  { %v213_v34 = vpop.xlane.xlu1 %212 }
 0x260   :  { %v218_v35 = vrot.slane %v213_v34, %v217_v32  ;;  %v222_v36 = vrot.slane %v213_v34, %v221_v33 }
 0x262   :  { %v225_v37 = vsub.f32 %v191_v24, %v218_v35  ;;  %v226_v38 = vsub.f32 %v194_v26, %v222_v36 }
 0x264   :  { %v227_v39 = vmul.f32 1.442695, %v225_v37  ;;  %v229_v40 = vmul.f32 1.442695, %v226_v38 }
 0x266   :  { %390 = vpow2.f32 %v227_v39 }
 0x267   :  { %392 = vpow2.f32 %v229_v40 }
 0x270   :  { %v391_v41 = vpop.eup %390 }
 0x271   :  { %v393_v42 = vpop.eup %392  ;;  %234 = vperm.xlu1 %384, %v391_v41  }
 0x272   :  { %237 = vperm.xlu0 %385, %v393_v42  }
 0x2f0   :  { %v235_v43 = vpop.permute.xlu1 %234 }
 0x2f1   :  { %v238_v44 = vpop.permute.xlu0 %237  ;;  %v242_v45 = vrot.slane %v235_v43, %v201_v25 }
 0x2f2   :  { %v246_v46 = vrot.slane %v238_v44, %v201_v25 }
 0x2f4   :  { %v247_v47 = vsel %vm207_vm1, %v246_v46, %v242_v45 }
 0x2f5   :  { %v249_v48 = vsel %vm210_vm2, %v247_v47, 0.0 }
 0x2f6   :  { %250 = vadd.xlane.f32.xlu1 %v249_v48 }
 0x383   :  { %v251_v49 = vpop.xlane.xlu1 %250 }
 0x384   :  { %394 = vrcp.f32 %v251_v49 }
 0x38e   :  { %v395_v50 = vpop.eup %394 }
 0x38f   :  { %v257_v51 = vrot.slane %v395_v50, %v217_v32  ;;  %v261_v53 = vrot.slane %v395_v50, %v221_v33 }
 0x391   :  { %v264_v52 = vmul.f32 %v391_v41, %v257_v51  ;;  %v265_v54 = vmul.f32 %v393_v42, %v261_v53 }
 0x393   :  { %269 = vperm.xlu0 %385, %v264_v52  }
 0x397   :  { %272 = vperm.xlu0 %385, %v265_v54  }
 0x412   :  { %v270_v55 = vpop.permute.xlu0 %269 }
 0x413   :  { %v277_v56 = vrot.slane %v270_v55, %v201_v25  ;;  %v289_v57 = vmul.f32 %v270_v55, %v636_v5 }
 0x415   :  { %v291_v58 = vsel %vm80_vm0, %v289_v57, 0.0  ;;  %285 = vst.msk [vmem:[#allocation11] sm:$0x1] %vm284_vm3, %v277_v56 }
 0x416   :  { %v292_v59 = vrot.slane %v291_v58, 4  ;;  %v273_v60 = vpop.permute.xlu0 %272 }
 0x417   :  { %v281_v61 = vrot.slane %v273_v60, %v201_v25  ;;  %v290_v62 = vmul.f32 %v273_v60, %v640_v7 }
 0x418   :  { %v293_v63 = vadd.f32 %v292_v59, %v291_v58 }
 0x419   :  { %v298_v0 = vsel %vm80_vm0, %v290_v62, 0.0  ;;  %286 = vst.msk [vmem:[#allocation11 + $0x1] sm:$0x1] %vm284_vm3, %v281_v61 }
 0x41a   :  { %v294_v1 = vrot.slane %v293_v63, 2  ;;  %v299_v2 = vrot.slane %v298_v0, 4 }
 0x41b   :  { %495 = shalt.err (!%p492_p8)
}
 0x41c   :  { %s496_s23 = scalar_lea.hbm %s689_s5, 32 }
 0x41d   :  { %p497_p9 = scmp.ne.s32.totalorder %s689_s5, %s496_s23  ;;  %p500_p10 = scmp.lt.u32.totalorder %s496_s23, %s689_s5 }
 0x41f   :  { %p502_p11 = pnand %p500_p10, %p497_p9 }
 0x421   :  { %505 = shalt.err (!%p502_p11)
}
 0x422   :  { %331 = dma.vmem_to_hbm [thread:$0]  %s326_s29, 32, %s689_s5, [#allocation12], %s542_s1, %s542_s1, %s543_s17   ;;  %v295_v3 = vadd.f32 %v294_v1, %v293_v63  ;;  %v300_v4 = vadd.f32 %v299_v2, %v298_v0  ;;  %vm305_vm4 = vcmask 253952  }
 0x423   :  { %s548_s7 = smov [#allocation10]  }
 0x424   :  { %v296_v5 = vrot.slane %v295_v3, 1  ;;  %v301_v6 = vrot.slane %v300_v4, 2  ;;  %s313_s0 = sshll.u32 %s548_s7, 4  ;;  %s314_s0 = int_to_ptr.vmem [resolvable:$true] %s313_s0 }
 0x425   :  { %s506_s8 = scalar_lea.vmem %s314_s0, 32  ;;  %p511_p13 = scmp.lt.s32.totalorder %s314_s0, %s314_s0 }
 0x426   :  { %v302_v7 = vadd.f32 %v301_v6, %v300_v4  ;;  %v297_v8 = vadd.f32 %v296_v5, %v295_v3  ;;  %p507_p12 = scmp.ne.s32.totalorder %s314_s0, %s506_s8  ;;  %p512_p0 = scmp.lt.s32.totalorder %s506_s8, %s506_s8 }
 0x428   :  { %v303_v9 = vrot.slane %v302_v7, 1  ;;  %306 = vst.msk [vmem:[#allocation10] sm:$0x1] %vm305_vm4, %v297_v8  ;;  %p513_p1 = por %p512_p0, %p511_p13 }
 0x42a   :  { %v304_v10 = vadd.f32 %v303_v9, %v302_v7  ;;  %p514_p2 = pnand %p513_p1, %p507_p12 }
 0x42c   :  { %307 = vst.msk [vmem:[#allocation10 + $0x1] sm:$0x1] %vm305_vm4, %v304_v10 }
 0x42d   :  { %517 = shalt.err (!%p514_p2)
}
 0x42e   :  { %s518_s10 = scalar_lea.hbm %s688_s4, 32 }
 0x42f   :  { %p519_p3 = scmp.ne.s32.totalorder %s688_s4, %s518_s10  ;;  %p522_p4 = scmp.lt.u32.totalorder %s518_s10, %s688_s4 }
 0x431   :  { %p524_p5 = pnand %p522_p4, %p519_p3 }
 0x433   :  { %527 = shalt.err (!%p524_p5)
}
 0x434   :  { %319 = dma.vmem_to_hbm [thread:$0]  %s314_s0, 32, %s688_s4, [#allocation4], %s542_s1, %s542_s1, %s543_s17  }
 0x435   :  { %534 = dma.done.wait [#allocation4], 32  }
 0x436   :  { %535 = vsyncadd [#allocation4], 4294967264 }
 0x437   :  { %536 = dma.done.wait [#allocation12], 32  }
 0x438   :  { %537 = vsyncadd [#allocation12], 4294967264 }
 0x439   :  { %338 = vsyncpa [#allocation3], 1 }
 0x43a   :  { %339 = vsyncpa [#allocation6], 1 }
 0x43b   :  { %340 = vsyncpa [#allocation9], 1 }
 0x43c   :  { %341 = vsyncpa [#allocation4], 1 }
 0x43d   :  { %342 = vsyncpa [#allocation12], 1 }

</bundles_post_ra>
